<compile_context>
chip_gen: v7x
topology: tpu7x:2x2x1
jax: 0.10.0
libtpu: 0.0.40
codegen_flags: <defaults>
</compile_context>

<pallas_src>
import functools

import jax
import jax.numpy as jnp
from jax.experimental import pallas as pl
from jax.experimental.pallas import tpu as pltpu


def _pow_const(x, p):
    """x ** p for a compile-time constant p >= 0.

    Small integer exponents use repeated multiplies (VPU) instead of
    jnp.power's exp(p*log(x)) (EUP); p == 0 returns exactly 1, sidestepping the
    pow(0, 0) -> NaN edge case when the target probability hits 1.0.
    """
    p = float(p)
    if p == 0.0:
        return jnp.ones_like(x)
    if p.is_integer() and 0.0 < p <= 16.0:
        n = int(p)
        result = None
        base = x
        while n:
            if n & 1:
                result = base if result is None else result * base
            n >>= 1
            if n:
                base = base * base
        return result
    return jnp.power(x, p)


def _asl_kernel(x_ref, tgt_ref, out_ref, *, gamma_pos, gamma_neg, eps, n_rows):
    i = pl.program_id(0)

    x = x_ref[...].astype(jnp.float32)        # (TB, C) logits, cast in-kernel
    tgt = tgt_ref[...]                        # (TB, 1) int32 class indices
    TB, C = x.shape

    # --- log-softmax with a single exp pass ---------------------------------
    m = jnp.max(x, axis=-1, keepdims=True)
    shifted = x - m
    e = jnp.exp(shifted)                      # one EUP pass over the tile
    s = jnp.sum(e, axis=-1, keepdims=True)    # (TB, 1)
    p = e * pl.reciprocal(s)                  # softmax probabilities
    log_preds = shifted - jnp.log(s)          # log-softmax

    # --- asymmetric focusing weight -----------------------------------------
    classes = jax.lax.broadcasted_iota(jnp.int32, (TB, C), dimension=1)
    is_target = classes == tgt                # (TB, C) bool one-hot

    # 1 - xs_pos - xs_neg == (1 - p) on the target column, p elsewhere.
    # Clamp >= 0: p can exceed 1.0 by an ulp, which would NaN a fractional pow.
    base = jnp.maximum(jnp.where(is_target, 1.0 - p, p), 0.0)

    gp, gn = float(gamma_pos), float(gamma_neg)
    small_int = lambda g: float(g).is_integer() and 0.0 <= float(g) <= 16.0
    if gp == gn:
        asym_w = _pow_const(base, gp)
    elif small_int(gp) and small_int(gn):
        asym_w = jnp.where(is_target, _pow_const(base, gp), _pow_const(base, gn))
    else:
        # Single EUP log + exp with a per-element exponent instead of two pows.
        g = jnp.where(is_target, gp, gn)
        asym_w = jnp.exp(g * jnp.log(jnp.maximum(base, 1e-30)))

    # --- label smoothing + loss (fused tail) ---------------------------------
    # t_sm = targets*(1-eps) + eps/C; fold it into the where on asym_w.
    c_pos = 1.0 - eps + eps / C
    c_neg = eps / C
    coef = jnp.where(is_target, c_pos, c_neg) * asym_w
    per_row = -jnp.sum(coef * log_preds, axis=-1, keepdims=True)   # (TB, 1)

    # Mask rows past the true batch size (padded last tile; Pallas does not
    # guarantee zero fill of the pad region).
    row_idx = i * TB + jax.lax.broadcasted_iota(jnp.int32, (TB, 1), dimension=0)
    per_row = jnp.where(row_idx < n_rows, per_row, 0.0)

    tile_sum = jnp.sum(per_row)                                    # scalar
    # Per-tile partial sum in this step's private output block; final mean in JAX.
    out_ref[...] = jnp.broadcast_to(tile_sum, out_ref.shape).astype(jnp.float32)


def _tile_plan(B, C, itemsize, block_rows=None):
    """Pick (TB, vmem_limit_bytes) from the running TPU generation."""
    try:
        vmem_cap = int(pltpu.get_tpu_info().vmem_capacity_bytes)
    except Exception:
        vmem_cap = 64 * 1024 * 1024           # conservative (v7x-sized) fallback

    # Scoped VMEM ceiling: always strictly below physical capacity.
    vmem_limit = min(vmem_cap - 8 * 1024 * 1024, 104 * 1024 * 1024)
    vmem_limit = max(vmem_limit, 32 * 1024 * 1024)
    usable = vmem_limit - 8 * 1024 * 1024     # margin for out blocks / internal scratch

    # Sublane-packing granule of the input dtype (bf16 packs 2 rows/sublane, ...).
    row_mult = {4: 8, 2: 16, 1: 32}.get(itemsize, 8)

    if block_rows is not None:
        return int(block_rows), int(vmem_limit)

    # Per batch row: double-buffered native-dtype input + ~6 live f32 temps
    # (+ small slack for the (TB,1) target block and output tile).
    per_row = C * (2 * itemsize + 6 * 4) + 1024
    tb = usable // max(1, per_row)
    tb = min(tb, 2048)                        # cap per-step latency
    if tb >= B:
        return B, int(vmem_limit)             # single full-extent tile
    tb = max(row_mult, (tb // row_mult) * row_mult)
    return int(tb), int(vmem_limit)


def asl_single_label(inputs, target, gamma_pos=0.0, gamma_neg=4.0, eps=0.1,
                     block_rows=None):
    """inputs: (B, C) float logits; target: (B,) int labels. Returns scalar mean loss."""
    B, C = inputs.shape
    target2d = target.astype(jnp.int32).reshape(B, 1)

    itemsize = jnp.dtype(inputs.dtype).itemsize
    TB, vmem_limit = _tile_plan(B, C, itemsize, block_rows)
    grid = pl.cdiv(B, TB)

    kernel = functools.partial(
        _asl_kernel,
        gamma_pos=float(gamma_pos), gamma_neg=float(gamma_neg),
        eps=float(eps), n_rows=B)

    partials = pl.pallas_call(
        kernel,
        out_shape=jax.ShapeDtypeStruct((grid, 8, 128), jnp.float32),
        grid=(grid,),
        in_specs=[
            pl.BlockSpec((TB, C), lambda i: (i, 0)),   # logits tile (native dtype)
            pl.BlockSpec((TB, 1), lambda i: (i, 0)),   # target indices tile
        ],
        # Each grid step owns its own (1,8,128) block -> batch axis is truly
        # parallel and can be split across both TensorCores on v7x.
        out_specs=pl.BlockSpec((1, 8, 128), lambda i: (i, 0, 0)),
        compiler_params=pltpu.CompilerParams(
            dimension_semantics=("parallel",),
            vmem_limit_bytes=vmem_limit),
    )(inputs, target2d)
    # TODO(synk): for extreme class counts (C so large that even 8 rows x C of
    # f32 temps overruns the per-generation VMEM budget), add a second grid
    # axis over C with an online (flash-style) running max / sum-exp.

    # 'mean' reduction (the module default).
    return jnp.sum(partials[:, 0, 0]) * (1.0 / B)


def _asl_reference(inputs, target, gamma_pos=0.0, gamma_neg=4.0, eps=0.1):
    """Pure-JAX reference mirroring the PyTorch forward, for sanity checking."""
    C = inputs.shape[-1]
    x = inputs.astype(jnp.float32)
    log_preds = jax.nn.log_softmax(x, axis=-1)
    targets = jax.nn.one_hot(target, C, dtype=x.dtype)
    anti = 1.0 - targets
    xs_pos = jnp.exp(log_preds) * targets
    xs_neg = (1.0 - jnp.exp(log_preds)) * anti
    w = jnp.power(1.0 - xs_pos - xs_neg, gamma_pos * targets + gamma_neg * anti)
    lp = log_preds * w
    t_sm = targets * (1.0 - eps) + eps / C
    loss = -(t_sm * lp)
    return jnp.mean(jnp.sum(loss, axis=-1))


if __name__ == "__main__":
    key = jax.random.PRNGKey(0)
    k1, k2, k3, k4, k5, k6 = jax.random.split(key, 6)

    # 1) small shapes consistent with (batch_size, num_classes), default gammas
    B1, C1 = 8, 32
    logits1 = jax.random.normal(k1, (B1, C1), dtype=jnp.float32)
    target1 = jax.random.randint(k2, (B1,), 0, C1, dtype=jnp.int32)
    loss1 = jax.block_until_ready(
        asl_single_label(logits1, target1, gamma_pos=0.0, gamma_neg=4.0, eps=0.1))
    ref1 = jax.block_until_ready(_asl_reference(logits1, target1))
    assert jnp.allclose(loss1, ref1, atol=1e-5, rtol=1e-4), (loss1, ref1)

    # 2) multi-tile grid with a padded last tile (exercises parallel partial sums
    #    + the padded-row mask)
    B2, C2 = 40, 128
    logits2 = jax.random.normal(k3, (B2, C2), dtype=jnp.float32)
    target2 = jax.random.randint(k4, (B2,), 0, C2, dtype=jnp.int32)
    loss2 = jax.block_until_ready(
        asl_single_label(logits2, target2, gamma_pos=0.0, gamma_neg=4.0, eps=0.1,
                         block_rows=16))
    ref2 = jax.block_until_ready(_asl_reference(logits2, target2))
    assert jnp.allclose(loss2, ref2, atol=1e-5, rtol=1e-4), (loss2, ref2)

    # 3) fractional / mixed gammas (exercises the single exp(g*log(base)) path)
    B3, C3 = 16, 64
    logits3 = jax.random.normal(k5, (B3, C3), dtype=jnp.float32)
    target3 = jax.random.randint(k6, (B3,), 0, C3, dtype=jnp.int32)
    loss3 = jax.block_until_ready(
        asl_single_label(logits3, target3, gamma_pos=0.5, gamma_neg=2.5, eps=0.1))
    ref3 = jax.block_until_ready(
        _asl_reference(logits3, target3, gamma_pos=0.5, gamma_neg=2.5, eps=0.1))
    assert jnp.allclose(loss3, ref3, atol=1e-5, rtol=1e-4), (loss3, ref3)

    # 4) bf16 logits ride the DMA in native dtype, cast to f32 in-kernel
    logits4 = logits2.astype(jnp.bfloat16)
    loss4 = jax.block_until_ready(
        asl_single_label(logits4, target2, gamma_pos=0.0, gamma_neg=4.0, eps=0.1,
                         block_rows=16))
    ref4 = jax.block_until_ready(_asl_reference(logits4, target2))
    assert jnp.allclose(loss4, ref4, atol=1e-5, rtol=1e-4), (loss4, ref4)

    print("KERNEL_OK")
</pallas_src>

<mosaic_0001>
module attributes {stable_mosaic.version = 11 : i64} {
  func.func @_asl_kernel(%arg0: i32, %arg1: memref<8x32xf32, #tpu.memory_space<vmem>>, %arg2: memref<8x1xi32, #tpu.memory_space<vmem>>, %arg3: memref<1x8x128xf32, #tpu.memory_space<vmem>>) attributes {dimension_semantics = [#tpu.dimension_semantics<parallel>], iteration_bounds = array<i64: 1>, scalar_prefetch = 0 : i64, scratch_operands = 0 : i64, tpu.core_type = #tpu.core_type<tc>, window_params = [{transform_indices = @transform_0, window_bounds = array<i64: 8, 32>}, {transform_indices = @transform_1, window_bounds = array<i64: 8, 1>}, {transform_indices = @transform_2, window_bounds = array<i64: 1, 8, 128>}]} {
    %c0 = arith.constant 0 : index
    %c0_0 = arith.constant 0 : index
    %0 = vector.load %arg1[%c0, %c0_0] : memref<8x32xf32, #tpu.memory_space<vmem>>, vector<8x32xf32>
    %c0_1 = arith.constant 0 : index
    %c0_2 = arith.constant 0 : index
    %1 = vector.load %arg2[%c0_1, %c0_2] : memref<8x1xi32, #tpu.memory_space<vmem>>, vector<8x1xi32>
    %cst = arith.constant dense<0xFF800000> : vector<8xf32>
    %2 = vector.multi_reduction <maximumf>, %0, %cst [1] : vector<8x32xf32> to vector<8xf32>
    %3 = vector.shape_cast %2 : vector<8xf32> to vector<8x1xf32>
    %4 = vector.broadcast %3 : vector<8x1xf32> to vector<8x32xf32>
    %5 = arith.subf %0, %4 : vector<8x32xf32>
    %6 = math.exp %5 : vector<8x32xf32>
    %cst_3 = arith.constant dense<0.000000e+00> : vector<8xf32>
    %7 = vector.multi_reduction <add>, %6, %cst_3 [1] : vector<8x32xf32> to vector<8xf32>
    %8 = vector.shape_cast %7 : vector<8xf32> to vector<8x1xf32>
    %9 = tpu.reciprocal %8 : vector<8x1xf32> -> vector<8x1xf32>
    %10 = vector.broadcast %9 : vector<8x1xf32> to vector<8x32xf32>
    %11 = arith.mulf %6, %10 : vector<8x32xf32>
    %12 = math.log %8 : vector<8x1xf32>
    %13 = vector.broadcast %12 : vector<8x1xf32> to vector<8x32xf32>
    %14 = arith.subf %5, %13 : vector<8x32xf32>
    %15 = tpu.iota {dimensions = array<i32: 1>} : vector<8x32xi32>
    %16 = vector.broadcast %1 : vector<8x1xi32> to vector<8x32xi32>
    %17 = arith.cmpi eq, %15, %16 : vector<8x32xi32>
    %cst_4 = arith.constant 1.000000e+00 : f32
    %18 = vector.broadcast %cst_4 : f32 to vector<8x32xf32>
    %19 = arith.subf %18, %11 : vector<8x32xf32>
    %20 = arith.select %17, %19, %11 : vector<8x32xi1>, vector<8x32xf32>
    %cst_5 = arith.constant 0.000000e+00 : f32
    %21 = vector.broadcast %cst_5 : f32 to vector<8x32xf32>
    %22 = arith.maximumf %20, %21 : vector<8x32xf32>
    %cst_6 = arith.constant 1.000000e+00 : f32
    %23 = vector.broadcast %cst_6 : f32 to vector<8x32xf32>
    %24 = arith.mulf %22, %22 : vector<8x32xf32>
    %25 = arith.mulf %24, %24 : vector<8x32xf32>
    %26 = arith.select %17, %23, %25 : vector<8x32xi1>, vector<8x32xf32>
    %cst_7 = arith.constant 0.903124988 : f32
    %cst_8 = arith.constant 3.125000e-03 : f32
    %27 = vector.broadcast %cst_7 : f32 to vector<8x32xf32>
    %28 = vector.broadcast %cst_8 : f32 to vector<8x32xf32>
    %29 = arith.select %17, %27, %28 : vector<8x32xi1>, vector<8x32xf32>
    %30 = arith.mulf %29, %26 : vector<8x32xf32>
    %31 = arith.mulf %30, %14 : vector<8x32xf32>
    %cst_9 = arith.constant dense<0.000000e+00> : vector<8xf32>
    %32 = vector.multi_reduction <add>, %31, %cst_9 [1] : vector<8x32xf32> to vector<8xf32>
    %33 = vector.shape_cast %32 : vector<8xf32> to vector<8x1xf32>
    %cst_10 = arith.constant 0.000000e+00 : f32
    %34 = vector.broadcast %cst_10 : f32 to vector<8x1xf32>
    %35 = arith.subf %34, %33 : vector<8x1xf32>
    %c8_i32 = arith.constant 8 : i32
    %36 = arith.muli %arg0, %c8_i32 : i32
    %37 = tpu.iota {dimensions = array<i32: 0>} : vector<8x1xi32>
    %38 = vector.broadcast %36 : i32 to vector<8x1xi32>
    %39 = arith.addi %38, %37 : vector<8x1xi32>
    %c8_i32_11 = arith.constant 8 : i32
    %40 = vector.broadcast %c8_i32_11 : i32 to vector<8x1xi32>
    %41 = arith.cmpi slt, %39, %40 : vector<8x1xi32>
    %cst_12 = arith.constant 0.000000e+00 : f32
    %42 = vector.broadcast %cst_12 : f32 to vector<8x1xf32>
    %43 = arith.select %41, %35, %42 : vector<8x1xi1>, vector<8x1xf32>
    %44 = vector.shape_cast %43 : vector<8x1xf32> to vector<1x8x1xf32>
    %cst_13 = arith.constant dense<0.000000e+00> : vector<1xf32>
    %45 = vector.multi_reduction <add>, %44, %cst_13 [1, 2] : vector<1x8x1xf32> to vector<1xf32>
    %46 = vector.shape_cast %45 : vector<1xf32> to vector<1x1x1xf32>
    %47 = vector.extract %46[0, 0, 0] : f32 from vector<1x1x1xf32>
    %48 = vector.broadcast %47 : f32 to vector<1x8x128xf32>
    %c0_14 = arith.constant 0 : index
    %c0_15 = arith.constant 0 : index
    %c0_16 = arith.constant 0 : index
    %49 = vector.load %arg3[%c0_14, %c0_15, %c0_16] : memref<1x8x128xf32, #tpu.memory_space<vmem>>, vector<1x8x128xf32>
    tpu.vector_store %arg3[%c0_14, %c0_15, %c0_16], %48 {strides = array<i32>} : memref<1x8x128xf32, #tpu.memory_space<vmem>>, vector<1x8x128xf32>,
    return
  }
  func.func @transform_0(%arg0: i32) -> (i32, i32) {
    %c0_i32 = arith.constant 0 : i32
    %c0_i32_0 = arith.constant 0 : i32
    return %arg0, %c0_i32 : i32, i32
  }
  func.func @transform_1(%arg0: i32) -> (i32, i32) {
    %c0_i32 = arith.constant 0 : i32
    %c0_i32_0 = arith.constant 0 : i32
    return %arg0, %c0_i32 : i32, i32
  }
  func.func @transform_2(%arg0: i32) -> (i32, i32, i32) {
    %c0_i32 = arith.constant 0 : i32
    %c0_i32_0 = arith.constant 0 : i32
    %c0_i32_1 = arith.constant 0 : i32
    return %arg0, %c0_i32, %c0_i32_0 : i32, i32, i32
  }
}

</mosaic_0001>

<bundles_post_ra>
// kernel: tpu_custom_call.1
= control target key start
LH: loop header
LB: loop body
LE: loop exit
PB: predicated region body
PF: predicated region fallthrough
CT: control target
= control target key end

     0   :  { %vm14_vm0 = vcmask 261120   ;;  %s158_s0 = inlined_call_operand.vmem [shape: f32[8,32], index: 0, kind: input, shape index: {}]   ;;  %s159_s1 = inlined_call_operand.vmem [shape: s32[8,1], index: 1, kind: input, shape index: {}]   ;;  %s160_s2 = inlined_call_operand.hbm [shape: f32[1,8,128], index: 2, kind: output, shape index: {}]  }
   0x1   :  { %v12_v0 = vld [vmem:[%s158_s0] sm:$0xff] }
   0x2   :  { %7 = vsyncpa [#allocation3], 0  ;;  %v15_v1 = vsel %vm14_vm0, %v12_v0, -inf  ;;  %v13_v2 = vld [vmem:[%s159_s1] sm:$0xff]  ;;  %v119_v3 = vmov 0   ;;  %v29_v10 = vlaneseq  ;;  %vm55_vm2 = vcmask 7168  }
   0x3   :  { %16 = vmax.xlane.f32.xlu0 %v15_v1  ;;  %87 = vset.pattern.permute.xlu1 %v119_v3  ;;  %v120_v23 = vmov 0.003125   ;;  %s121_s0 = smov [#allocation2]  }
   0x4   :  { %88 = vset.pattern.permute.xlu0 %v119_v3  ;;  %32 = vperm.xlu1 %87, %v13_v2   ;;  %v30_v11 = vand.u32 127, %v29_v10  ;;  %s74_s1 = sshll.u32 %s121_s0, 4  ;;  %s75_s1 = int_to_ptr.vmem [resolvable:$true] %s74_s1 }
   0x5   :  { %s95_s14 = scalar_lea.vmem %s75_s1, 128  ;;  %p100_p1 = scmp.lt.s32.totalorder %s75_s1, %s75_s1 }
   0x6   :  { %p96_p0 = scmp.ne.s32.totalorder %s75_s1, %s95_s14  ;;  %p101_p2 = scmp.lt.s32.totalorder %s95_s14, %s95_s14 }
   0x8   :  { %p102_p3 = por %p101_p2, %p100_p1 }
   0xa   :  { %p103_p4 = pnand %p102_p3, %p96_p0 }
  0x83   :  { %v33_v12 = vpop.permute.xlu1 %32 }
  0x84   :  { %vm34_vm1 = vcmp.eq.s32.totalorder %v30_v11, %v33_v12 }
  0x85   :  { %v41_v24 = vsel %vm34_vm1, 0.903125, %v120_v23 }
  0x90   :  { %v17_v4 = vpop.xlane.xlu0 %16 }
  0x91   :  { %v18_v5 = vsub.f32 %v12_v0, %v17_v4 }
  0x93   :  { %v19_v6 = vmul.f32 1.442695, %v18_v5 }
  0x95   :  { %89 = vpow2.f32 %v19_v6 }
  0x9f   :  { %v90_v7 = vpop.eup %89 }
  0xa0   :  { %v21_v8 = vsel %vm14_vm0, %v90_v7, 0.0 }
  0xa1   :  { %22 = vadd.xlane.f32.xlu0 %v21_v8 }
 0x12e   :  { %v23_v9 = vpop.xlane.xlu0 %22 }
 0x12f   :  { %91 = vrcp.f32 %v23_v9 }
 0x130   :  { %93 = vlog2.f32 %v23_v9 }
 0x139   :  { %v92_v13 = vpop.eup %91 }
 0x13a   :  { %v25_v14 = vmul.f32 %v92_v13, %v90_v7  ;;  %v94_v17 = vpop.eup %93 }
 0x13b   :  { %v27_v20 = vmul.f32 0.6931472, %v94_v17 }
 0x13c   :  { %v35_v15 = vsub.f32 1.0, %v25_v14 }
 0x13d   :  { %v28_v26 = vsub.f32 %v18_v5, %v27_v20 }
 0x13e   :  { %v36_v16 = vsel %vm34_vm1, %v35_v15, %v25_v14 }
 0x13f   :  { %v37_v18 = vmax.f32 %v36_v16, 0.0 }
 0x141   :  { %v38_v19 = vmul.f32 %v37_v18, %v37_v18 }
 0x143   :  { %v39_v21 = vmul.f32 %v38_v19, %v38_v19 }
 0x145   :  { %v40_v22 = vsel %vm34_vm1, 1.0, %v39_v21 }
 0x146   :  { %v42_v25 = vmul.f32 %v41_v24, %v40_v22 }
 0x148   :  { %v43_v27 = vmul.f32 %v42_v25, %v28_v26 }
 0x14a   :  { %v44_v28 = vsel %vm14_vm0, %v43_v27, 0.0 }
 0x14b   :  { %45 = vadd.xlane.f32.xlu1 %v44_v28 }
 0x1d8   :  { %v46_v29 = vpop.xlane.xlu1 %45 }
 0x1d9   :  { %v47_v30 = vsub.f32 0.0, %v46_v29 }
 0x1db   :  { %v56_v31 = vsel %vm55_vm2, %v47_v30, 0.0 }
 0x1dc   :  { %57 = vadd.xlane.f32.xlu0 %v56_v31 }
 0x269   :  { %v58_v32 = vpop.xlane.xlu0 %57 }
 0x26a   :  { %v59_v33 = vrot.slane %v58_v32, 4 }
 0x26c   :  { %v60_v34 = vadd.f32 %v59_v33, %v58_v32 }
 0x26e   :  { %v61_v35 = vrot.slane %v60_v34, 2 }
 0x270   :  { %v62_v36 = vadd.f32 %v61_v35, %v60_v34 }
 0x272   :  { %v63_v37 = vrot.slane %v62_v36, 1 }
 0x274   :  { %v64_v38 = vadd.f32 %v63_v37, %v62_v36 }
 0x276   :  { %82 = vpush %v64_v38 }
 0x2a7   :  { %s83_s13 = spop %82 }
 0x2a8   :  { %v66_v39 = vstv %s83_s13 }
 0x2a9   :  { %67 = vst [vmem:[#allocation2] sm:$0xff] %v66_v39 }
 0x2aa   :  { %106 = shalt.err (!%p103_p4)
}
 0x2ab   :  { %s107_s17 = scalar_lea.hbm %s160_s2, 128 }
 0x2ac   :  { %p108_p5 = scmp.ne.s32.totalorder %s160_s2, %s107_s17  ;;  %p111_p6 = scmp.lt.u32.totalorder %s107_s17, %s160_s2 }
 0x2ae   :  { %p113_p7 = pnand %p111_p6, %p108_p5 }
 0x2b0   :  { %116 = shalt.err (!%p113_p7)
}
 0x2b1   :  { %77 = dma.vmem_to_hbm [thread:$0]  %s75_s1, 128, %s160_s2, [#allocation3]  }
 0x2b2   :  { %117 = dma.done.wait [#allocation3], 128  }
 0x2b3   :  { %118 = vsyncadd [#allocation3], 4294967168 }
 0x2b4   :  { %81 = vsyncpa [#allocation3], 1 }

</bundles_post_ra>
